<compile_context>
chip_gen: v6e
topology: v6e:2x2x1
jax: 0.10.0
libtpu: 0.0.40
codegen_flags: <defaults>
</compile_context>

<pallas_src>
import jax
import jax.numpy as jnp
from jax.experimental import pallas as pl
from jax.experimental.pallas import tpu as pltpu


def _upconv_kernel(w_ref, b_ref, x_ref, o_ref):
    # w_ref: (4*Cout, Cin) bf16  -- row index = oc*4 + di*2 + dj
    # b_ref: (4*Cout, 1)   f32
    # x_ref: (Cin, tcol)   f32   -- one image, a tile of flattened pixels
    # o_ref: (4*Cout, tcol) f32
    x = x_ref[...].astype(jnp.bfloat16)      # native bf16 MXU path, f32 accumulate
    acc = jnp.dot(w_ref[...], x, preferred_element_type=jnp.float32)
    o_ref[...] = (acc + b_ref[...]).astype(o_ref.dtype)


def _round_up(v, m):
    return ((v + m - 1) // m) * m


def upconv_forward(x_nchw, weight, bias, *, tcol_target=2048):
    """ConvTranspose2d(Cin, Cout, kernel_size=2, stride=2, bias=True).

    x_nchw : (N, Cin, H, W) f32
    weight : (Cin, Cout, 2, 2)  -- PyTorch ConvTranspose2d weight layout
    bias   : (Cout,)
    returns: (N, Cout, 2H, 2W) f32
    """
    N, Cin, H, W = x_nchw.shape
    Cout = weight.shape[1]
    HW = H * W
    NC = 4 * Cout

    # ---- glue: view-only / tiny ------------------------------------------
    x_rows = x_nchw.reshape(N, Cin, HW)          # contiguous merge, no copy
    # (Cin, Cout, 2, 2) -> (Cout, 2, 2, Cin) -> (4*Cout, Cin); tiny tensor.
    w_t = jnp.transpose(weight, (1, 2, 3, 0)).reshape(NC, Cin).astype(jnp.bfloat16)
    # bias per output row (repeated across the 4 kernel taps), column vector.
    b_col = jnp.repeat(bias.astype(jnp.float32), 4).reshape(NC, 1)

    # ---- tiling -------------------------------------------------------------
    tcol = min(tcol_target, _round_up(HW, 128))   # lane-dense, big as useful
    grid = (N, pl.cdiv(HW, tcol))                 # boundary blocks are masked

    cost = pl.CostEstimate(
        flops=2 * N * HW * Cin * NC,
        transcendentals=0,
        bytes_accessed=(x_rows.size * 4 + w_t.size * 2 + b_col.size * 4
                        + N * NC * HW * 4),
    )

    out_rows = pl.pallas_call(
        _upconv_kernel,
        out_shape=jax.ShapeDtypeStruct((N, NC, HW), jnp.float32),
        grid_spec=pltpu.PrefetchScalarGridSpec(
            num_scalar_prefetch=0,
            grid=grid,
            in_specs=[
                pl.BlockSpec((NC, Cin), lambda n, c: (0, 0)),             # weights
                pl.BlockSpec((NC, 1), lambda n, c: (0, 0)),               # bias
                pl.BlockSpec((None, Cin, tcol), lambda n, c: (n, 0, c)),  # x tile
            ],
            out_specs=pl.BlockSpec((None, NC, tcol), lambda n, c: (n, 0, c)),
        ),
        compiler_params=pltpu.CompilerParams(
            dimension_semantics=("parallel", "parallel")),
        cost_estimate=cost,
    )(w_t, b_col, x_rows)

    # ---- glue: single output transpose (pixel-shuffle + to NCHW) -----------
    # (N, 4*Cout, HW) -> (N, Cout, 2, 2, H, W) -> (N, Cout, H, 2, W, 2)
    #                 -> (N, Cout, 2H, 2W)
    y = out_rows.reshape(N, Cout, 2, 2, H, W)
    y = jnp.transpose(y, (0, 1, 4, 2, 5, 3))
    return y.reshape(N, Cout, 2 * H, 2 * W)


def upconv_reference(x_nchw, weight, bias):
    """Plain-JAX f32 reference for ConvTranspose2d(k=2, s=2)."""
    N, Cin, H, W = x_nchw.shape
    Cout = weight.shape[1]
    # out[n, o, 2i+p, 2j+q] = sum_c x[n,c,i,j] * W[c,o,p,q] + b[o]
    y = jnp.einsum('nchw,copq->nohpwq', x_nchw, weight)
    y = y.reshape(N, Cout, 2 * H, 2 * W)
    return y + bias[None, :, None, None]


if __name__ == "__main__":
    # Module default: input_ch=64, output_ch=32; small spatial/batch.
    N, Cin, Cout, H, W = 2, 64, 32, 16, 16

    key = jax.random.PRNGKey(0)
    kx, kw, kb = jax.random.split(key, 3)
    x = jax.random.normal(kx, (N, Cin, H, W), dtype=jnp.float32)
    weight = jax.random.normal(kw, (Cin, Cout, 2, 2), dtype=jnp.float32) * 0.05
    bias = jax.random.normal(kb, (Cout,), dtype=jnp.float32) * 0.1

    out = jax.block_until_ready(upconv_forward(x, weight, bias))
    ref = upconv_reference(x, weight, bias)

    assert out.shape == (N, Cout, 2 * H, 2 * W), out.shape
    # bf16 MXU operands with f32 accumulation -> slightly looser tolerance.
    max_err = float(jnp.max(jnp.abs(out - ref)))
    assert jnp.allclose(out, ref, atol=2e-2, rtol=2e-2), max_err

    print("KERNEL_OK")
</pallas_src>

<mosaic_0001>
module attributes {stable_mosaic.version = 11 : i64} {
  func.func @_upconv_kernel(%arg0: i32, %arg1: i32, %arg2: memref<128x64xbf16, #tpu.memory_space<vmem>>, %arg3: memref<128x1xf32, #tpu.memory_space<vmem>>, %arg4: memref<1x64x256xf32, #tpu.memory_space<vmem>>, %arg5: memref<1x128x256xf32, #tpu.memory_space<vmem>>) attributes {dimension_semantics = [#tpu.dimension_semantics<parallel>, #tpu.dimension_semantics<parallel>], iteration_bounds = array<i64: 2, 1>, scalar_prefetch = 0 : i64, scratch_operands = 0 : i64, tpu.core_type = #tpu.core_type<tc>, window_params = [{pipeline_mode = #tpu.pipeline_mode<synchronous>, transform_indices = @transform_0, window_bounds = array<i64: 128, 64>}, {pipeline_mode = #tpu.pipeline_mode<synchronous>, transform_indices = @transform_1, window_bounds = array<i64: 128, 1>}, {transform_indices = @transform_2, window_bounds = array<i64: 1, 64, 256>}, {transform_indices = @transform_3, window_bounds = array<i64: 1, 128, 256>}]} {
    %c0 = arith.constant 0 : index
    %c0_0 = arith.constant 0 : index
    %c0_1 = arith.constant 0 : index
    %0 = vector.load %arg4[%c0, %c0_0, %c0_1] : memref<1x64x256xf32, #tpu.memory_space<vmem>>, vector<1x64x256xf32>
    %1 = vector.shape_cast %0 : vector<1x64x256xf32> to vector<64x256xf32>
    %2 = arith.truncf %1 : vector<64x256xf32> to vector<64x256xbf16>
    %c0_2 = arith.constant 0 : index
    %c0_3 = arith.constant 0 : index
    %3 = vector.load %arg2[%c0_2, %c0_3] : memref<128x64xbf16, #tpu.memory_space<vmem>>, vector<128x64xbf16>
    %cst = arith.constant dense<0.000000e+00> : vector<128x256xf32>
    %4 = tpu.matmul %3, %2, %cst {dimension_numbers = #tpu.dot_dimension_numbers<[1], [0], [0], [1], [0, 0, 1, 1], [], []>} : vector<128x64xbf16>, vector<64x256xbf16>, vector<128x256xf32> -> vector<128x256xf32>
    %c0_4 = arith.constant 0 : index
    %c0_5 = arith.constant 0 : index
    %5 = vector.load %arg3[%c0_4, %c0_5] : memref<128x1xf32, #tpu.memory_space<vmem>>, vector<128x1xf32>
    %6 = vector.broadcast %5 : vector<128x1xf32> to vector<128x256xf32>
    %7 = arith.addf %4, %6 : vector<128x256xf32>
    %c0_6 = arith.constant 0 : index
    %c0_7 = arith.constant 0 : index
    %c0_8 = arith.constant 0 : index
    %8 = vector.load %arg5[%c0_6, %c0_7, %c0_8] : memref<1x128x256xf32, #tpu.memory_space<vmem>>, vector<1x128x256xf32>
    %9 = vector.shape_cast %8 : vector<1x128x256xf32> to vector<128x256xf32>
    %10 = vector.shape_cast %7 : vector<128x256xf32> to vector<1x128x256xf32>
    tpu.vector_store %arg5[%c0_6, %c0_7, %c0_8], %10 {strides = array<i32>} : memref<1x128x256xf32, #tpu.memory_space<vmem>>, vector<1x128x256xf32>,
    return
  }
  func.func @transform_0(%arg0: i32, %arg1: i32) -> (i32, i32) {
    %c0_i32 = arith.constant 0 : i32
    %c0_i32_0 = arith.constant 0 : i32
    %c0_i32_1 = arith.constant 0 : i32
    return %c0_i32, %c0_i32_0 : i32, i32
  }
  func.func @transform_1(%arg0: i32, %arg1: i32) -> (i32, i32) {
    %c0_i32 = arith.constant 0 : i32
    %c0_i32_0 = arith.constant 0 : i32
    %c0_i32_1 = arith.constant 0 : i32
    return %c0_i32, %c0_i32_0 : i32, i32
  }
  func.func @transform_2(%arg0: i32, %arg1: i32) -> (i32, i32, i32) {
    %c0_i32 = arith.constant 0 : i32
    %c0_i32_0 = arith.constant 0 : i32
    return %arg0, %c0_i32, %arg1 : i32, i32, i32
  }
  func.func @transform_3(%arg0: i32, %arg1: i32) -> (i32, i32, i32) {
    %c0_i32 = arith.constant 0 : i32
    %c0_i32_0 = arith.constant 0 : i32
    return %arg0, %c0_i32, %arg1 : i32, i32, i32
  }
}

</mosaic_0001>

<bundles_post_ra>
// kernel: tpu_custom_call.1
= control target key start
LH: loop header
LB: loop body
LE: loop exit
PB: predicated region body
PF: predicated region fallthrough
CT: control target
= control target key end

     0   :  { %8 = vsyncpa [#allocation3], 0  ;;  %s1220_s0 = inlined_call_operand.vmem [shape: bf16[128,64], index: 0, kind: input, shape index: {}]   ;;  %s1221_s1 = inlined_call_operand.vmem [shape: f32[128,1], index: 1, kind: input, shape index: {}]   ;;  %s1222_s2 = inlined_call_operand.hbm [shape: f32[2,64,256], index: 2, kind: input, shape index: {}]   ;;  %s1223_s3 = inlined_call_operand.hbm [shape: f32[2,128,256], index: 3, kind: output, shape index: {}]  }
   0x1   :  { %10 = vsyncpa [#allocation3 + $0x1], 0 }
   0x2   :  { %11 = vsyncpa [#allocation4], 0 }
   0x3   :  { %13 = vsyncpa [#allocation4 + $0x1], 0  ;;  %s914_s12 = smov 0   ;;  %s916_s13 = smov 0  }
   0x4   :  { %s918_s14 = smov 0   ;;  %s920_s15 = smov 0  }
   0x5   :  { %s922_s16 = smov 0   ;;  %s924_s17 = smov 0  }
   0x6 LB: > { %s659_s18 = sadd.s32 4294967295, %s885_s17   ;;  %s660_s19 = sadd.s32 4294967294, %s885_s17   ;;  %s885_s17 = sphi %s924_s17, %s19_s17   ;;  %s881_s16 = sphi %s922_s16, %s1234_s16   ;;  %s877_s15 = sphi %s920_s15, %s1233_s15   ;;  %s873_s14 = sphi %s918_s14, %s1232_s14   ;;  %s869_s13 = sphi %s916_s13, %s1231_s13   ;;  %s865_s12 = sphi %s914_s12, %s1230_s12  }
   0x7   : > { %s31_s20 = sadd.s32 1, %s881_s16  ;;  %s82_s21 = sadd.s32 1, %s873_s14 }
   0x8   : > { %p33_p0 = scmp.ge.s32.totalorder %s31_s20, 2  ;;  %p89_p1 = scmp.ne.s32.totalorder %s873_s14, %s869_s13 }
   0x9   : > { %p90_p2 = scmp.eq.s32.totalorder %s885_s17, 0  ;;  %p95_p3 = scmp.ne.s32.totalorder %s869_s13, %s865_s12 }
   0xa   : > { %s1236_s20 = smov (%p33_p0, %s31_s20), 0  ;;  %p96_p5 = scmp.eq.s32.totalorder %s659_s18, 0 }
   0xb   : > { %p955_p4 = por %p90_p2, %p89_p1  ;;  %s77_s23 = ssub.s32 %s881_s16, %s1236_s20 }
   0xc   : > { %p121_p6 = scmp.eq.s32.totalorder %s659_s18, 1  ;;  %p80_p7 = scmp.eq.s32.totalorder %s77_s23, 0 }
   0xd   : > { %p961_p8 = por %p96_p5, %p95_p3  ;;  %p127_p10 = scmp.eq.s32.totalorder %s660_s19, 1 }
   0xe   : > { %p965_p9 = por %p121_p6, %p89_p1  ;;  %p712_p13 = scmp.lt.s32.totalorder %s885_s17, 2 }
   0xf   : > { %s970_s26 = scalar_select %p80_p7, %s873_s14, %s82_s21  }
  0x10   : > { %p972_p11 = por %p127_p10, %p95_p3  ;;  %s153_s28 = sand.u32 1, %s873_s14  }
  0x11   : > { %s663_s29 = sshll.u32 %s153_s28, 7  ;;  %s690_s30 = sshll.u32 %s881_s16, 11 }
  0x12   : > { %s165_s6 = scalar_lea.hbm %s1222_s2, %s690_s30  ;;  %s157_s7 = scalar_lea.vmem [#allocation2], %s663_s29 }
  0x13   : > { %s166_s8 = sshll.u32 %s157_s7, 4  ;;  %p985_p0 = pnand %p712_p13, %p955_p4  ;;  %s167_s8 = int_to_ptr.vmem [resolvable:$true] %s166_s8 }
  0x14   : > { %p666_p1 = scmp.ge.s32.totalorder %s885_s17, 1  ;;  %s154_s10 = scalar_lea.sflag [#allocation3], %s153_s28 }
  0x15   : > { %p779_p2 = pneg %p985_p0  ;;  %s790_s11 = scalar_lea.vmem %s167_s8, 2048 }
  0x16   : > { %p791_p3 = scmp.ne.s32.totalorder %s167_s8, %s790_s11  ;;  %s887_s18 = smov [#allocation2]  }
  0x17   : > { %s795_s19 = sshll.u32 %s887_s18, 4  ;;  %s796_s19 = int_to_ptr.vmem [resolvable:$false] %s795_s19 }
  0x18   : > { %p793_p5 = pnand %p791_p3, %p779_p2  ;;  %s797_s21 = scalar_lea.vmem %s796_s19, 4096 }
  0x19   : > { %p798_p7 = scmp.lt.s32.totalorder %s167_s8, %s796_s19  ;;  %p799_p10 = scmp.lt.s32.totalorder %s797_s21, %s790_s11 }
  0x1a   : > { %p794_p6 = pneg %p793_p5 }
  0x1b   : > { %p800_p12 = por %p799_p10, %p798_p7 }
  0x1d   : > { %p801_p4 = pnand %p800_p12, %p794_p6 }
  0x1f   : > { %804 = shalt.err (!%p801_p4)
}
  0x20   : > { %s888_s22 = smov 256   ;;  %s889_s23 = smov 16  }
  0x21   : > { %707 = dma.hbm_to_vmem [thread:$0]  (!%p985_p0), %s165_s6, 2048, %s167_s8, %s154_s10, %s888_s22, %s888_s22, %s889_s23  }
  0x22   : > { %p174_p13 = scmp.lt.s32.totalorder %s885_s17, 3 }
  0x24   : > { %p175_p2 = pnand %p666_p1, %p174_p13 }
  0x25   : > { %s998_s28 = sand.u32 (!%p175_p2), 1, %s869_s13  }
  0x26   : > { %178 = sbr.rel (%p175_p2) target bundleno = 302 (0x12e), region = 32  ;;  %s667_s29 = sshll.u32 (!%p175_p2), %s998_s28, 7 }
  0x27   : > { %s181_s30 = scalar_lea.sflag (!%p175_p2), [#allocation3], %s998_s28  ;;  %s1002_s4 = scalar_lea.vmem (!%p175_p2), [#allocation2], %s667_s29 }
  0x2b   : > { %856 = dma.done.wait (%p961_p8), %s181_s30, 2048  }
  0x2c   : > { %858 = vsyncadd (%p961_p8), %s181_s30, 4294965248  ;;  %v890_v0 = vmov 0   ;;  %v223_v1 = vld [vmem:[%s1002_s4 + $0x68] sm:$0xff]  ;;  %v225_v2 = vld [vmem:[%s1002_s4 + $0x78] sm:$0xff]  ;;  %vm386_vm0 = vcmask 523264   ;;  %s668_s24 = sshll.u32 %s998_s28, 8 }
  0x2d   : > { %443 = vmatprep.mubr.bf16.mxu0 %v890_v0  ;;  %483 = vmatprep.mubr.bf16.mxu1 %v890_v0  ;;  %v222_v3 = vld [vmem:[%s1002_s4 + $0x60] sm:$0xff]  ;;  %v233_v4 = vpack.c.bf16 %v225_v2, %v223_v1  ;;  %v224_v5 = vld [vmem:[%s1002_s4 + $0x70] sm:$0xff]  ;;  %v219_v6 = vld [vmem:[%s1002_s4 + $0x48] sm:$0xff]  ;;  %s1123_s5 = scalar_lea.vmem [#allocation5], %s668_s24  ;;  %s691_s6 = sshll.u32 %s877_s15, 12 }
  0x2e   : > { %768 = vset.pattern.permute.xlu1 %v890_v0  ;;  %767 = vset.pattern.permute.xlu0 %v890_v0  ;;  %v221_v7 = vld [vmem:[%s1002_s4 + $0x58] sm:$0xff]  ;;  %v232_v8 = vpack.c.bf16 %v224_v5, %v222_v3  ;;  %v218_v10 = vld [vmem:[%s1002_s4 + $0x40] sm:$0xff]  ;;  %v220_v11 = vld [vmem:[%s1002_s4 + $0x50] sm:$0xff]  ;;  %s572_s7 = sshll.u32 %s1123_s5, 4  ;;  %s1165_s10 = scalar_lea.hbm %s1223_s3, %s691_s6  ;;  %s1167_s7 = int_to_ptr.vmem [resolvable:$true] %s572_s7 }
  0x2f   : > { %v231_v9 = vpack.c.bf16 %v221_v7, %v219_v6  ;;  %v215_v12 = vld [vmem:[%s1002_s4 + $0x28] sm:$0xff]  ;;  %419 = vmatprep.subr.bf16.mxu0 %v233_v4  ;;  %692 = vmatprep.subr.bf16.mxu1 %v233_v4  ;;  %v217_v13 = vld [vmem:[%s1002_s4 + $0x38] sm:$0xff]  ;;  %v230_v14 = vpack.c.bf16 %v220_v11, %v218_v10  ;;  %v214_v15 = vld [vmem:[%s1002_s4 + $0x20] sm:$0xff]  ;;  %s557_s15 = scalar_lea.sflag [#allocation4], %s998_s28  ;;  %s805_s11 = scalar_lea.vmem %s1167_s7, 4096 }
  0x30   : > { %420 = vmatpush1.bf16.msra.mxu0 %v232_v8  ;;  %696 = vmatpush1.bf16.msra.mxu1 %v232_v8  ;;  %v216_v16 = vld [vmem:[%s1002_s4 + $0x30] sm:$0xff]  ;;  %v229_v17 = vpack.c.bf16 %v217_v13, %v215_v12  ;;  %v211_v18 = vld [vmem:[%s1002_s4 + $0x8] sm:$0xff]  ;;  %v213_v19 = vld [vmem:[%s1002_s4 + $0x18] sm:$0xff]  ;;  %p806_p8 = scmp.ne.s32.totalorder %s1167_s7, %s805_s11  ;;  %s891_s18 = smov [#allocation5]  }
  0x31   : > { %421 = vmatprep.subr.bf16.mxu0 %v231_v9  ;;  %693 = vmatprep.subr.bf16.mxu1 %v231_v9  ;;  %v228_v20 = vpack.c.bf16 %v216_v16, %v214_v15  ;;  %v210_v21 = vld [vmem:[%s1002_s4] sm:$0xff]  ;;  %v227_v22 = vpack.c.bf16 %v213_v19, %v211_v18  ;;  %v212_v23 = vld [vmem:[%s1002_s4 + $0x10] sm:$0xff]  ;;  %v253_v29 = vld [vmem:[%s1221_s1 + $0x18] sm:$0xff]  ;;  %s809_s19 = sshll.u32 %s891_s18, 4  ;;  %s810_s19 = int_to_ptr.vmem [resolvable:$false] %s809_s19 }
  0x32   : > { %v226_v24 = vpack.c.bf16 %v212_v23, %v210_v21  ;;  %v252_v25 = vld [vmem:[%s1221_s1 + $0x10] sm:$0xff]  ;;  %v250_v26 = vld [vmem:[%s1221_s1] sm:$0xff]  ;;  %v251_v30 = vld [vmem:[%s1221_s1 + $0x8] sm:$0xff]  ;;  %p807_p12 = pnand %p806_p8, %p965_p9  ;;  %s811_s21 = scalar_lea.vmem %s810_s19, 8192 }
  0x33   : > { %v769_v27 = vld [vmem:[%s1220_s0] sm:$0xff]   ;;  %278 = vperm.xlu1 %768, %v252_v25   ;;  %268 = vperm.xlu0 %767, %v250_v26   ;;  %v255_v31 = vld [vmem:[%s1221_s1 + $0x28] sm:$0xff]  ;;  %v257_v35 = vld [vmem:[%s1221_s1 + $0x38] sm:$0xff]  ;;  %p812_p1 = scmp.lt.s32.totalorder %s1167_s7, %s810_s19  ;;  %p813_p3 = scmp.lt.s32.totalorder %s811_s21, %s805_s11 }
  0x34   : > { %422 = vmatpush1.bf16.msra.mxu0 %v230_v14  ;;  %697 = vmatpush1.bf16.msra.mxu1 %v230_v14  ;;  %v770_v28 = vld [vmem:[%s1220_s0 + $0x20] sm:$0xff]   ;;  %v771_v33 = vld [vmem:[%s1220_s0 + $0x8] sm:$0xff]   ;;  %v256_v36 = vld [vmem:[%s1221_s1 + $0x30] sm:$0xff]  ;;  %p808_p0 = pneg %p807_p12 }
  0x35   : > { %423 = vmatprep.subr.bf16.mxu0 %v229_v17  ;;  %694 = vmatprep.subr.bf16.mxu1 %v229_v17  ;;  %v254_v32 = vld [vmem:[%s1221_s1 + $0x20] sm:$0xff]  ;;  %v772_v34 = vld [vmem:[%s1220_s0 + $0x28] sm:$0xff]   ;;  %v773_v39 = vld [vmem:[%s1220_s0 + $0x10] sm:$0xff]   ;;  %p814_p5 = por %p813_p3, %p812_p1 }
  0x36   : > { %v259_v37 = vld [vmem:[%s1221_s1 + $0x48] sm:$0xff]  ;;  %v258_v38 = vld [vmem:[%s1221_s1 + $0x40] sm:$0xff]  ;;  %v774_v40 = vld [vmem:[%s1220_s0 + $0x30] sm:$0xff]  }
  0x37   : > { %283 = vperm.xlu1 %768, %v253_v29   ;;  %273 = vperm.xlu0 %767, %v251_v30   ;;  %v261_v41 = vld [vmem:[%s1221_s1 + $0x58] sm:$0xff]  ;;  %v260_v42 = vld [vmem:[%s1221_s1 + $0x50] sm:$0xff]  ;;  %v263_v43 = vld [vmem:[%s1221_s1 + $0x68] sm:$0xff]  ;;  %p815_p6 = pnand %p814_p5, %p808_p0 }
  0x38   : > { %424 = vmatpush1.bf16.msra.mxu0 %v228_v20  ;;  %698 = vmatpush1.bf16.msra.mxu1 %v228_v20  ;;  %v262_v44 = vld [vmem:[%s1221_s1 + $0x60] sm:$0xff]  ;;  %v775_v45 = vld [vmem:[%s1220_s0 + $0x18] sm:$0xff]   ;;  %v264_v48 = vld [vmem:[%s1221_s1 + $0x70] sm:$0xff] }
  0x39   : > { %425 = vmatprep.subr.bf16.mxu0 %v227_v22  ;;  %695 = vmatprep.subr.bf16.mxu1 %v227_v22  ;;  %v776_v46 = vld [vmem:[%s1220_s0 + $0x38] sm:$0xff]  }
  0x3a   : > { %v265_v47 = vld [vmem:[%s1221_s1 + $0x78] sm:$0xff] }
  0x3b   : > { %293 = vperm.xlu1 %768, %v255_v31   ;;  %288 = vperm.xlu0 %767, %v254_v32  }
  0x3c   : > { %426 = vmatpush1.bf16.msra.mxu0 %v226_v24  ;;  %699 = vmatpush1.bf16.msra.mxu1 %v226_v24 }
  0x3f   : > { %677 = vmatmul.mubr.msk.bf16.vlgmr.msra.gmra.mxu0 %vm386_vm0, %v769_v27  ;;  %681 = vmatmul.mubr.msk.bf16.vlgmr.msra.gmra.mxu1 %vm386_vm0, %v770_v28 }
  0x40   : > { %453 = vmatprep.mubr.bf16.mxu0 %v890_v0  ;;  %493 = vmatprep.mubr.bf16.mxu1 %v890_v0 }
  0x41   : > { %303 = vperm.xlu1 %768, %v257_v35   ;;  %298 = vperm.xlu0 %767, %v256_v36  }
  0x45   : > { %313 = vperm.xlu1 %768, %v259_v37   ;;  %308 = vperm.xlu0 %767, %v258_v38  }
  0x47   : > { %678 = vmatmul.mubr.msk.bf16.gmra.mxu0 %vm386_vm0, %v771_v33  ;;  %682 = vmatmul.mubr.msk.bf16.gmra.mxu1 %vm386_vm0, %v772_v34 }
  0x48   : > { %463 = vmatprep.mubr.bf16.mxu0 %v890_v0  ;;  %503 = vmatprep.mubr.bf16.mxu1 %v890_v0 }
  0x49   : > { %323 = vperm.xlu1 %768, %v261_v41   ;;  %318 = vperm.xlu0 %767, %v260_v42  }
  0x4d   : > { %333 = vperm.xlu1 %768, %v263_v43   ;;  %328 = vperm.xlu0 %767, %v262_v44  }
  0x4f   : > { %679 = vmatmul.mubr.msk.bf16.gmra.mxu0 %vm386_vm0, %v773_v39  ;;  %683 = vmatmul.mubr.msk.bf16.gmra.mxu1 %vm386_vm0, %v774_v40 }
  0x50   : > { %473 = vmatprep.mubr.bf16.mxu0 %v890_v0  ;;  %513 = vmatprep.mubr.bf16.mxu1 %v890_v0 }
  0x51   : > { %343 = vperm.xlu1 %768, %v265_v47   ;;  %338 = vperm.xlu0 %767, %v264_v48  }
  0x57   : > { %680 = vmatmul.mubr.msk.bf16.gmra.mxu0 %vm386_vm0, %v775_v45  ;;  %684 = vmatmul.mubr.msk.bf16.gmra.mxu1 %vm386_vm0, %v776_v46 }
  0xae   : > { %v269_v49 = vpop.permute.xlu0 %268  ;;  %v279_v50 = vpop.permute.xlu1 %278 }
  0xb2   : > { %v274_v51 = vpop.permute.xlu0 %273  ;;  %v284_v52 = vpop.permute.xlu1 %283 }
  0xb6   : > { %v1114_v53 = vpop.permute.xlu0 %288  ;;  %v1116_v54 = vpop.permute.xlu1 %293 }
  0xbc   : > { %v1118_v55 = vpop.permute.xlu0 %298  ;;  %v1120_v56 = vpop.permute.xlu1 %303 }
  0xc0   : > { %v309_v57 = vpop.permute.xlu0 %308  ;;  %v314_v0 = vpop.permute.xlu1 %313 }
  0xc4   : > { %v319_v9 = vpop.permute.xlu0 %318  ;;  %v324_v18 = vpop.permute.xlu1 %323 }
  0xc8   : > { %v329_v27 = vpop.permute.xlu0 %328  ;;  %v334_v36 = vpop.permute.xlu1 %333 }
  0xcc   : > { %v339_v45 = vpop.permute.xlu0 %338 }
  0xff   : > { %v445_v58 = vpop.f32.mrf.mxu0  ;;  %v485_v59 = vpop.f32.mrf.mxu1 }
 0x100   : > { %v446_v60 = vadd.f32 %v445_v58, %v269_v49  ;;  %v486_v61 = vadd.f32 %v485_v59, %v309_v57 }
 0x101   : > { %v447_v62 = vpop.f32.mrf.mxu0  ;;  %v487_v63 = vpop.f32.mrf.mxu1 }
 0x102   : > { %524 = vst [vmem:[%s1123_s5] sm:$0xff] %v446_v60  ;;  %540 = vst [vmem:[%s1123_s5 + $0x80] sm:$0xff] %v486_v61  ;;  %v448_v1 = vadd.f32 %v447_v62, %v269_v49  ;;  %v488_v2 = vadd.f32 %v487_v63, %v309_v57  ;;  %v344_v57 = vpop.permute.xlu1 %343 }
 0x103   : > { %v449_v3 = vpop.f32.mrf.mxu0  ;;  %v489_v4 = vpop.f32.mrf.mxu1 }
 0x104   : > { %525 = vst [vmem:[%s1123_s5 + $0x8] sm:$0xff] %v448_v1  ;;  %541 = vst [vmem:[%s1123_s5 + $0x88] sm:$0xff] %v488_v2  ;;  %v450_v5 = vadd.f32 %v449_v3, %v274_v51  ;;  %v490_v6 = vadd.f32 %v489_v4, %v314_v0 }
 0x105   : > { %v451_v7 = vpop.f32.mrf.mxu0  ;;  %v491_v8 = vpop.f32.mrf.mxu1 }
 0x106   : > { %526 = vst [vmem:[%s1123_s5 + $0x10] sm:$0xff] %v450_v5  ;;  %542 = vst [vmem:[%s1123_s5 + $0x90] sm:$0xff] %v490_v6  ;;  %v452_v10 = vadd.f32 %v451_v7, %v274_v51  ;;  %v492_v11 = vadd.f32 %v491_v8, %v314_v0 }
 0x107   : > { %v455_v12 = vpop.f32.mrf.mxu0  ;;  %v495_v13 = vpop.f32.mrf.mxu1 }
 0x108   : > { %527 = vst [vmem:[%s1123_s5 + $0x18] sm:$0xff] %v452_v10  ;;  %543 = vst [vmem:[%s1123_s5 + $0x98] sm:$0xff] %v492_v11  ;;  %v456_v14 = vadd.f32 %v455_v12, %v279_v50  ;;  %v496_v15 = vadd.f32 %v495_v13, %v319_v9 }
 0x109   : > { %v457_v16 = vpop.f32.mrf.mxu0  ;;  %v497_v17 = vpop.f32.mrf.mxu1 }
 0x10a   : > { %528 = vst [vmem:[%s1123_s5 + $0x20] sm:$0xff] %v456_v14  ;;  %544 = vst [vmem:[%s1123_s5 + $0xa0] sm:$0xff] %v496_v15  ;;  %v458_v19 = vadd.f32 %v457_v16, %v279_v50  ;;  %v498_v20 = vadd.f32 %v497_v17, %v319_v9 }
 0x10b   : > { %v459_v21 = vpop.f32.mrf.mxu0  ;;  %v499_v22 = vpop.f32.mrf.mxu1 }
 0x10c   : > { %529 = vst [vmem:[%s1123_s5 + $0x28] sm:$0xff] %v458_v19  ;;  %545 = vst [vmem:[%s1123_s5 + $0xa8] sm:$0xff] %v498_v20  ;;  %v460_v23 = vadd.f32 %v459_v21, %v284_v52  ;;  %v500_v24 = vadd.f32 %v499_v22, %v324_v18 }
 0x10d   : > { %v461_v25 = vpop.f32.mrf.mxu0  ;;  %v501_v26 = vpop.f32.mrf.mxu1 }
 0x10e   : > { %530 = vst [vmem:[%s1123_s5 + $0x30] sm:$0xff] %v460_v23  ;;  %546 = vst [vmem:[%s1123_s5 + $0xb0] sm:$0xff] %v500_v24  ;;  %v462_v28 = vadd.f32 %v461_v25, %v284_v52  ;;  %v502_v29 = vadd.f32 %v501_v26, %v324_v18 }
 0x10f   : > { %v465_v30 = vpop.f32.mrf.mxu0  ;;  %v505_v31 = vpop.f32.mrf.mxu1 }
 0x110   : > { %531 = vst [vmem:[%s1123_s5 + $0x38] sm:$0xff] %v462_v28  ;;  %547 = vst [vmem:[%s1123_s5 + $0xb8] sm:$0xff] %v502_v29  ;;  %v466_v32 = vadd.f32 %v465_v30, %v1114_v53  ;;  %v506_v33 = vadd.f32 %v505_v31, %v329_v27 }
 0x111   : > { %v467_v34 = vpop.f32.mrf.mxu0  ;;  %v507_v35 = vpop.f32.mrf.mxu1 }
 0x112   : > { %532 = vst [vmem:[%s1123_s5 + $0x40] sm:$0xff] %v466_v32  ;;  %548 = vst [vmem:[%s1123_s5 + $0xc0] sm:$0xff] %v506_v33  ;;  %v468_v37 = vadd.f32 %v467_v34, %v1114_v53  ;;  %v508_v38 = vadd.f32 %v507_v35, %v329_v27 }
 0x113   : > { %v469_v39 = vpop.f32.mrf.mxu0  ;;  %v509_v40 = vpop.f32.mrf.mxu1 }
 0x114   : > { %533 = vst [vmem:[%s1123_s5 + $0x48] sm:$0xff] %v468_v37  ;;  %549 = vst [vmem:[%s1123_s5 + $0xc8] sm:$0xff] %v508_v38  ;;  %v470_v41 = vadd.f32 %v469_v39, %v1116_v54  ;;  %v510_v42 = vadd.f32 %v509_v40, %v334_v36 }
 0x115   : > { %v471_v43 = vpop.f32.mrf.mxu0  ;;  %v511_v44 = vpop.f32.mrf.mxu1 }
 0x116   : > { %534 = vst [vmem:[%s1123_s5 + $0x50] sm:$0xff] %v470_v41  ;;  %550 = vst [vmem:[%s1123_s5 + $0xd0] sm:$0xff] %v510_v42  ;;  %v472_v46 = vadd.f32 %v471_v43, %v1116_v54  ;;  %v512_v47 = vadd.f32 %v511_v44, %v334_v36 }
 0x117   : > { %v475_v48 = vpop.f32.mrf.mxu0  ;;  %v515_v49 = vpop.f32.mrf.mxu1 }
 0x118   : > { %535 = vst [vmem:[%s1123_s5 + $0x58] sm:$0xff] %v472_v46  ;;  %551 = vst [vmem:[%s1123_s5 + $0xd8] sm:$0xff] %v512_v47  ;;  %v476_v50 = vadd.f32 %v475_v48, %v1118_v55  ;;  %v516_v51 = vadd.f32 %v515_v49, %v339_v45 }
 0x119   : > { %v477_v52 = vpop.f32.mrf.mxu0  ;;  %v517_v53 = vpop.f32.mrf.mxu1 }
 0x11a   : > { %536 = vst [vmem:[%s1123_s5 + $0x60] sm:$0xff] %v476_v50  ;;  %552 = vst [vmem:[%s1123_s5 + $0xe0] sm:$0xff] %v516_v51  ;;  %v478_v54 = vadd.f32 %v477_v52, %v1118_v55  ;;  %v518_v58 = vadd.f32 %v517_v53, %v339_v45 }
 0x11b   : > { %v479_v59 = vpop.f32.mrf.mxu0  ;;  %v519_v60 = vpop.f32.mrf.mxu1 }
 0x11c   : > { %537 = vst [vmem:[%s1123_s5 + $0x68] sm:$0xff] %v478_v54  ;;  %553 = vst [vmem:[%s1123_s5 + $0xe8] sm:$0xff] %v518_v58  ;;  %v480_v61 = vadd.f32 %v479_v59, %v1120_v56  ;;  %v520_v62 = vadd.f32 %v519_v60, %v344_v57 }
 0x11d   : > { %v481_v63 = vpop.f32.mrf.mxu0  ;;  %v521_v0 = vpop.f32.mrf.mxu1 }
 0x11e   : > { %538 = vst [vmem:[%s1123_s5 + $0x70] sm:$0xff] %v480_v61  ;;  %554 = vst [vmem:[%s1123_s5 + $0xf0] sm:$0xff] %v520_v62  ;;  %v482_v55 = vadd.f32 %v481_v63, %v1120_v56  ;;  %v522_v1 = vadd.f32 %v521_v0, %v344_v57 }
 0x120   : > { %539 = vst [vmem:[%s1123_s5 + $0x78] sm:$0xff] %v482_v55  ;;  %555 = vst [vmem:[%s1123_s5 + $0xf8] sm:$0xff] %v522_v1 }
 0x121   : > { %818 = shalt.err (!%p815_p6)
}
 0x122   : > { %s819_s22 = scalar_lea.hbm %s1165_s10, 4096  ;;  %s823_s30 = scalar_lea.hbm %s1223_s3, 8192 }
 0x123   : > { %p820_p7 = scmp.ne.s32.totalorder %s1165_s10, %s819_s22  ;;  %p824_p13 = scmp.lt.s32.totalorder %s1165_s10, %s1223_s3 }
 0x124   : > { %p825_p2 = scmp.lt.s32.totalorder %s823_s30, %s819_s22 }
 0x125   : > { %p821_p10 = pnand %p820_p7, %p965_p9 }
 0x126   : > { %p826_p8 = por %p825_p2, %p824_p13 }
 0x127   : > { %p822_p4 = pneg %p821_p10 }
 0x129   : > { %p827_p12 = pnand %p826_p8, %p822_p4 }
 0x12b   : > { %830 = shalt.err (!%p827_p12)
}
 0x12c   : > { %s892_s5 = smov 256   ;;  %s893_s6 = smov 16  }
 0x12d   : > { %702 = dma.vmem_to_hbm [thread:$0]  (%p965_p9), %s1167_s7, 4096, %s1165_s10, %s557_s15, %s892_s5, %s892_s5, %s893_s6  }
 0x12e PF: > { %s587_s8 = sand.u32 1, %s865_s12   ;;  %p1229_p0 = scmp.ge.s32.totalorder %s885_s17, 2 }
 0x12f   : > { %s588_s9 = scalar_lea.sflag [#allocation4], %s587_s8 }
 0x130   : > { %p709_p1 = pnand %p1229_p0, %p972_p11 }
 0x132   : > { %p710_p3 = pneg %p709_p1 }
 0x134   : > { %860 = dma.done.wait (%p710_p3), %s588_s9, 4096  }
 0x135   : > { %862 = vsyncadd (%p710_p3), %s588_s9, 4294963200  ;;  %s19_s17 = sadd.s32 1, %s885_s17   ;;  %s1230_s12 = smov %s869_s13 }
 0x136   : > { %p16_p5 = scmp.ge.s32.totalorder %s19_s17, 4   ;;  %s1231_s13 = smov %s873_s14 }
 0x137   : > { %s1232_s14 = smov %s970_s26  ;;  %s1233_s15 = smov %s881_s16 }
 0x138   : > { %s1234_s16 = smov %s1236_s20  ;;  %18 = sbr.rel (!%p16_p5) target bundleno = 6 (0x6), region = 77 }
 0x13d   :  { %593 = vsyncpa [#allocation3], 1 }
 0x13e   :  { %595 = vsyncpa [#allocation3 + $0x1], 1 }
 0x13f   :  { %596 = vsyncpa [#allocation4], 1 }
 0x140   :  { %598 = vsyncpa [#allocation4 + $0x1], 1 }

</bundles_post_ra>
